<compile_context>
chip_gen: v6e
topology: v6e:2x2x1
jax: 0.10.0
libtpu: 0.0.40
codegen_flags: <defaults>
</compile_context>

<pallas_src>
import jax
import jax.numpy as jnp
from jax.experimental import pallas as pl
from jax.experimental.pallas import tpu as pltpu


# ---------------------------------------------------------------------------
# Kernels
# ---------------------------------------------------------------------------

def ffn_resident_kernel(x_ref, w1_ref, b1_ref, w2_ref, b2_ref, o_ref):
    """Weights fully VMEM-resident; grid is over token tiles only."""
    h = jnp.dot(x_ref[...], w1_ref[...], preferred_element_type=jnp.float32)
    h = jnp.maximum(h + b1_ref[...], 0.0)
    o_ref[...] = (
        jnp.dot(h.astype(w2_ref.dtype), w2_ref[...],
                preferred_element_type=jnp.float32)
        + b2_ref[...]
    ).astype(o_ref.dtype)


def ffn_stream_kernel(x_ref, w1_ref, b1_ref, w2_ref, b2_ref, o_ref):
    """Weights streamed in F-chunks; the f32 output block is the accumulator.

    Note: when M % TM != 0 the padded rows of the x block are uninitialized.
    This is benign because rows are independent and the final store is masked;
    do not introduce any reduction over the M axis without revisiting this.
    """
    k = pl.program_id(1)

    # First linear, this F-chunk: (TM, E) @ (E, TF) -> f32 on the MXU.
    h = jnp.dot(x_ref[...], w1_ref[...], preferred_element_type=jnp.float32)
    # Bias + ReLU for this F-chunk (exact: ReLU is elementwise over F).
    h = jnp.maximum(h + b1_ref[...], 0.0)
    # Second linear, partial sum over this F-chunk: (TM, TF) @ (TF, E).
    partial = jnp.dot(h.astype(w2_ref.dtype), w2_ref[...],
                      preferred_element_type=jnp.float32)

    @pl.when(k == 0)
    def _():
        o_ref[...] = partial + b2_ref[...]

    @pl.when(k > 0)
    def _():
        o_ref[...] += partial


# ---------------------------------------------------------------------------
# Tiling / VMEM planning
# ---------------------------------------------------------------------------

def _vmem_capacity_bytes():
    try:
        cap = int(pltpu.get_tpu_info().vmem_capacity_bytes)
        if cap > 0:
            return cap
    except Exception:
        pass
    return 64 * 1024 * 1024  # conservative fallback (v7x per-TC)


def _tm_candidates(M):
    """Largest-first token-tile candidates; always multiples of 8 (or full M)."""
    if M <= 8:
        return [max(M, 1)]
    full = min((M // 8) * 8, 512)
    cands = [full]
    for c in (512, 384, 256, 128):
        if c < full:
            cands.append(c)
    return cands


def _tf_candidates(F):
    cands = [c for c in (1024, 512, 256, 128) if F % c == 0]
    return cands if cands else [F]


def _resident_vmem_bytes(tm, E, F):
    # Conservatively count every BlockSpec'd operand as double-buffered.
    w = 2 * (E * F * 2 + F * E * 2)      # bf16 W1 + W2
    x = 2 * tm * E * 2                   # bf16 x tile
    out = 2 * tm * E * 4                 # f32 out tile
    hidden = tm * F * 4                  # f32 hidden intermediate
    b = 2 * (F * 4 + E * 4)              # biases
    return w + x + out + hidden + b


def _stream_vmem_bytes(tm, tf, E, F):
    x = 2 * tm * E * 2
    w1 = 2 * E * tf * 2
    w2 = 2 * tf * E * 2
    out = 2 * tm * E * 4
    hidden = tm * tf * 4
    b = 2 * (tf * 4 + E * 4)
    return x + w1 + w2 + out + hidden + b


def _vmem_limit(est, cap):
    return int(min(cap, max(int(est * 1.35) + (8 << 20), 32 << 20)))


# ---------------------------------------------------------------------------
# Wrapper
# ---------------------------------------------------------------------------

def feed_forward(x, w1, b1, w2, b2, *, compute_dtype=jnp.bfloat16,
                 mode="auto", tm=None, tf=None):
    """x: (B, S, E). w1: (E, F), b1: (F,), w2: (F, E), b2: (E,). Returns f32."""
    B, S, E = x.shape
    F_dim = w1.shape[1]
    M = B * S

    x2d = x.reshape(M, E).astype(compute_dtype)
    w1c = w1.astype(compute_dtype)
    w2c = w2.astype(compute_dtype)
    b1_2d = b1.reshape(1, F_dim).astype(jnp.float32)
    b2_2d = b2.reshape(1, E).astype(jnp.float32)

    cap = _vmem_capacity_bytes()
    budget = int(0.55 * cap)

    tm_cands = [tm] if tm is not None else _tm_candidates(M)
    tf_cands = [tf] if tf is not None else _tf_candidates(F_dim)

    # --- choose mode / tiles ------------------------------------------------
    use_resident = False
    TM = tm_cands[-1]
    if mode == "resident":
        use_resident, TM = True, tm_cands[0]
    elif mode == "auto":
        for cand in tm_cands:
            if _resident_vmem_bytes(cand, E, F_dim) <= budget:
                use_resident, TM = True, cand
                break

    if use_resident:
        est = _resident_vmem_bytes(TM, E, F_dim)
        grid = (pl.cdiv(M, TM),)
        in_specs = [
            pl.BlockSpec((TM, E), lambda i: (i, 0)),        # x tile
            pl.BlockSpec((E, F_dim), lambda i: (0, 0)),     # W1 (resident)
            pl.BlockSpec((1, F_dim), lambda i: (0, 0)),     # b1 (resident)
            pl.BlockSpec((F_dim, E), lambda i: (0, 0)),     # W2 (resident)
            pl.BlockSpec((1, E), lambda i: (0, 0)),         # b2 (resident)
        ]
        out_specs = pl.BlockSpec((TM, E), lambda i: (i, 0))
        kernel = ffn_resident_kernel
        dim_sem = ("parallel",)
        bytes_accessed = 4 * E * F_dim + M * E * 2 + M * E * 4 + 4 * (F_dim + E)
    else:
        chosen = None
        for c_tm in tm_cands:
            for c_tf in tf_cands:
                if _stream_vmem_bytes(c_tm, c_tf, E, F_dim) <= budget:
                    chosen = (c_tm, c_tf)
                    break
            if chosen is not None:
                break
        if chosen is None:
            chosen = (tm_cands[-1], tf_cands[-1])
        TM, TF = chosen
        est = _stream_vmem_bytes(TM, TF, E, F_dim)
        n_i = pl.cdiv(M, TM)
        grid = (n_i, F_dim // TF)
        in_specs = [
            pl.BlockSpec((TM, E), lambda i, k: (i, 0)),     # x tile (resident over k)
            pl.BlockSpec((E, TF), lambda i, k: (0, k)),     # W1 F-chunk
            pl.BlockSpec((1, TF), lambda i, k: (0, k)),     # b1 F-chunk
            pl.BlockSpec((TF, E), lambda i, k: (k, 0)),     # W2 F-chunk
            pl.BlockSpec((1, E), lambda i, k: (0, 0)),      # b2 (resident)
        ]
        out_specs = pl.BlockSpec((TM, E), lambda i, k: (i, 0))
        kernel = ffn_stream_kernel
        dim_sem = ("parallel", "arbitrary")
        bytes_accessed = (n_i * 4 * E * F_dim + M * E * 2 + M * E * 4
                          + n_i * 4 * (F_dim + E))

    cost = pl.CostEstimate(flops=4 * M * E * F_dim,
                           transcendentals=0,
                           bytes_accessed=int(bytes_accessed))

    out2d = pl.pallas_call(
        kernel,
        out_shape=jax.ShapeDtypeStruct((M, E), jnp.float32),
        grid_spec=pltpu.PrefetchScalarGridSpec(
            num_scalar_prefetch=0,
            grid=grid,
            in_specs=in_specs,
            out_specs=out_specs,
        ),
        compiler_params=pltpu.CompilerParams(
            dimension_semantics=dim_sem,
            vmem_limit_bytes=_vmem_limit(est, cap),
        ),
        cost_estimate=cost,
    )(x2d, w1c, b1_2d, w2c, b2_2d)

    return out2d.reshape(B, S, E)


# ---------------------------------------------------------------------------
# Self-test
# ---------------------------------------------------------------------------

def _make_params(key, E, FF):
    kw1, kb1, kw2, kb2 = jax.random.split(key, 4)
    bound1 = 1.0 / (E ** 0.5)
    w1 = jax.random.uniform(kw1, (E, FF), jnp.float32, -bound1, bound1)
    b1 = jax.random.uniform(kb1, (FF,), jnp.float32, -bound1, bound1)
    bound2 = 1.0 / (FF ** 0.5)
    w2 = jax.random.uniform(kw2, (FF, E), jnp.float32, -bound2, bound2)
    b2 = jax.random.uniform(kb2, (E,), jnp.float32, -bound2, bound2)
    return w1, b1, w2, b2


def _check(out, x, w1, b1, w2, b2):
    B, S, E = x.shape
    # Reference 1: identical bf16-operand / f32-accumulate path (tight check).
    xb = x.reshape(-1, E).astype(jnp.bfloat16)
    h = jnp.maximum(
        jnp.dot(xb, w1.astype(jnp.bfloat16),
                preferred_element_type=jnp.float32) + b1, 0.0)
    ref_bf16 = (jnp.dot(h.astype(jnp.bfloat16), w2.astype(jnp.bfloat16),
                        preferred_element_type=jnp.float32) + b2).reshape(B, S, E)
    assert jnp.allclose(out, ref_bf16, atol=2e-3, rtol=2e-3)
    # Reference 2: pure-f32 torch-equivalent semantics (loose check).
    ref_f32 = (jnp.maximum(x.reshape(-1, E) @ w1 + b1, 0.0) @ w2
               + b2).reshape(B, S, E)
    assert jnp.allclose(out, ref_f32, atol=5e-2, rtol=5e-2)


if __name__ == "__main__":
    key = jax.random.PRNGKey(0)
    k1, k2, k3, k4 = jax.random.split(key, 4)

    # Test 1: small module-consistent shapes (batch=2, seq=8, embed=32, ff=64)
    # -> auto-selects the RESIDENT path.
    B, S, E, FF = 2, 8, 32, 64
    x = jax.random.normal(k1, (B, S, E), dtype=jnp.float32)
    w1, b1, w2, b2 = _make_params(k2, E, FF)
    out = jax.block_until_ready(feed_forward(x, w1, b1, w2, b2))
    assert out.shape == (B, S, E)
    _check(out, x, w1, b1, w2, b2)

    # Test 2: force the STREAM path (multi token tiles, multi F-chunks) to
    # exercise the in-place o_ref accumulation.
    B2, S2, E2, FF2 = 2, 64, 128, 512
    x2 = jax.random.normal(k3, (B2, S2, E2), dtype=jnp.float32)
    w1b, b1b, w2b, b2b = _make_params(k4, E2, FF2)
    out2 = jax.block_until_ready(
        feed_forward(x2, w1b, b1b, w2b, b2b, mode="stream", tm=64, tf=128))
    assert out2.shape == (B2, S2, E2)
    _check(out2, x2, w1b, b1b, w2b, b2b)

    print("KERNEL_OK")
</pallas_src>

<mosaic_0001>
module attributes {stable_mosaic.version = 11 : i64} {
  func.func @ffn_resident_kernel(%arg0: i32, %arg1: memref<16x32xbf16, #tpu.memory_space<vmem>>, %arg2: memref<32x64xbf16, #tpu.memory_space<vmem>>, %arg3: memref<1x64xf32, #tpu.memory_space<vmem>>, %arg4: memref<64x32xbf16, #tpu.memory_space<vmem>>, %arg5: memref<1x32xf32, #tpu.memory_space<vmem>>, %arg6: memref<16x32xf32, #tpu.memory_space<vmem>>) attributes {dimension_semantics = [#tpu.dimension_semantics<parallel>], iteration_bounds = array<i64: 1>, scalar_prefetch = 0 : i64, scratch_operands = 0 : i64, tpu.core_type = #tpu.core_type<tc>, window_params = [{transform_indices = @transform_0, window_bounds = array<i64: 16, 32>}, {pipeline_mode = #tpu.pipeline_mode<synchronous>, transform_indices = @transform_1, window_bounds = array<i64: 32, 64>}, {pipeline_mode = #tpu.pipeline_mode<synchronous>, transform_indices = @transform_2, window_bounds = array<i64: 1, 64>}, {pipeline_mode = #tpu.pipeline_mode<synchronous>, transform_indices = @transform_3, window_bounds = array<i64: 64, 32>}, {pipeline_mode = #tpu.pipeline_mode<synchronous>, transform_indices = @transform_4, window_bounds = array<i64: 1, 32>}, {transform_indices = @transform_5, window_bounds = array<i64: 16, 32>}]} {
    %c0 = arith.constant 0 : index
    %c0_0 = arith.constant 0 : index
    %0 = vector.load %arg1[%c0, %c0_0] : memref<16x32xbf16, #tpu.memory_space<vmem>>, vector<16x32xbf16>
    %c0_1 = arith.constant 0 : index
    %c0_2 = arith.constant 0 : index
    %1 = vector.load %arg2[%c0_1, %c0_2] : memref<32x64xbf16, #tpu.memory_space<vmem>>, vector<32x64xbf16>
    %cst = arith.constant dense<0.000000e+00> : vector<16x64xf32>
    %2 = tpu.matmul %0, %1, %cst {dimension_numbers = #tpu.dot_dimension_numbers<[1], [0], [0], [1], [0, 0, 1, 1], [], []>} : vector<16x32xbf16>, vector<32x64xbf16>, vector<16x64xf32> -> vector<16x64xf32>
    %c0_3 = arith.constant 0 : index
    %c0_4 = arith.constant 0 : index
    %3 = vector.load %arg3[%c0_3, %c0_4] : memref<1x64xf32, #tpu.memory_space<vmem>>, vector<1x64xf32>
    %4 = vector.broadcast %3 : vector<1x64xf32> to vector<16x64xf32>
    %5 = arith.addf %2, %4 : vector<16x64xf32>
    %cst_5 = arith.constant 0.000000e+00 : f32
    %6 = vector.broadcast %cst_5 : f32 to vector<16x64xf32>
    %7 = arith.maximumf %5, %6 : vector<16x64xf32>
    %8 = arith.truncf %7 : vector<16x64xf32> to vector<16x64xbf16>
    %c0_6 = arith.constant 0 : index
    %c0_7 = arith.constant 0 : index
    %9 = vector.load %arg4[%c0_6, %c0_7] : memref<64x32xbf16, #tpu.memory_space<vmem>>, vector<64x32xbf16>
    %cst_8 = arith.constant dense<0.000000e+00> : vector<16x32xf32>
    %10 = tpu.matmul %8, %9, %cst_8 {dimension_numbers = #tpu.dot_dimension_numbers<[1], [0], [0], [1], [0, 0, 1, 1], [], []>} : vector<16x64xbf16>, vector<64x32xbf16>, vector<16x32xf32> -> vector<16x32xf32>
    %c0_9 = arith.constant 0 : index
    %c0_10 = arith.constant 0 : index
    %11 = vector.load %arg5[%c0_9, %c0_10] : memref<1x32xf32, #tpu.memory_space<vmem>>, vector<1x32xf32>
    %12 = vector.broadcast %11 : vector<1x32xf32> to vector<16x32xf32>
    %13 = arith.addf %10, %12 : vector<16x32xf32>
    %c0_11 = arith.constant 0 : index
    %c0_12 = arith.constant 0 : index
    %14 = vector.load %arg6[%c0_11, %c0_12] : memref<16x32xf32, #tpu.memory_space<vmem>>, vector<16x32xf32>
    tpu.vector_store %arg6[%c0_11, %c0_12], %13 {strides = array<i32>} : memref<16x32xf32, #tpu.memory_space<vmem>>, vector<16x32xf32>,
    return
  }
  func.func @transform_0(%arg0: i32) -> (i32, i32) {
    %c0_i32 = arith.constant 0 : i32
    %c0_i32_0 = arith.constant 0 : i32
    return %arg0, %c0_i32 : i32, i32
  }
  func.func @transform_1(%arg0: i32) -> (i32, i32) {
    %c0_i32 = arith.constant 0 : i32
    %c0_i32_0 = arith.constant 0 : i32
    %c0_i32_1 = arith.constant 0 : i32
    return %c0_i32, %c0_i32_0 : i32, i32
  }
  func.func @transform_2(%arg0: i32) -> (i32, i32) {
    %c0_i32 = arith.constant 0 : i32
    %c0_i32_0 = arith.constant 0 : i32
    %c0_i32_1 = arith.constant 0 : i32
    return %c0_i32, %c0_i32_0 : i32, i32
  }
  func.func @transform_3(%arg0: i32) -> (i32, i32) {
    %c0_i32 = arith.constant 0 : i32
    %c0_i32_0 = arith.constant 0 : i32
    %c0_i32_1 = arith.constant 0 : i32
    return %c0_i32, %c0_i32_0 : i32, i32
  }
  func.func @transform_4(%arg0: i32) -> (i32, i32) {
    %c0_i32 = arith.constant 0 : i32
    %c0_i32_0 = arith.constant 0 : i32
    %c0_i32_1 = arith.constant 0 : i32
    return %c0_i32, %c0_i32_0 : i32, i32
  }
  func.func @transform_5(%arg0: i32) -> (i32, i32) {
    %c0_i32 = arith.constant 0 : i32
    %c0_i32_0 = arith.constant 0 : i32
    return %arg0, %c0_i32 : i32, i32
  }
}

</mosaic_0001>

<bundles_post_ra>
// kernel: tpu_custom_call.1
= control target key start
LH: loop header
LB: loop body
LE: loop exit
PB: predicated region body
PF: predicated region fallthrough
CT: control target
= control target key end

     0   :  { %v275_v1 = vmov 0.0   ;;  %vm276_vm0 = vmmov 0   ;;  %vm52_vm1 = vcmask 261120   ;;  %s343_s0 = inlined_call_operand.vmem [shape: bf16[16,32], index: 0, kind: input, shape index: {}]   ;;  %s344_s1 = inlined_call_operand.vmem [shape: bf16[32,64], index: 1, kind: input, shape index: {}]   ;;  %s345_s2 = inlined_call_operand.vmem [shape: f32[1,64], index: 2, kind: input, shape index: {}]   ;;  %s346_s3 = inlined_call_operand.vmem [shape: bf16[64,32], index: 3, kind: input, shape index: {}]   ;;  %s347_s4 = inlined_call_operand.vmem [shape: f32[1,32], index: 4, kind: input, shape index: {}]   ;;  %s348_s5 = inlined_call_operand.hbm [shape: f32[16,32], index: 5, kind: output, shape index: {}]  }
   0x1   :  { %v246_v0 = vld [vmem:[%s344_s1 + $0x8] sm:$0xff]   ;;  %221 = vmatprep.subr.bf16.mxu0 %v275_v1  ;;  %229 = vmatprep.subr.bf16.mxu1 %v275_v1  ;;  %v247_v2 = vld [vmem:[%s344_s1] sm:$0xff]   ;;  %v249_v3 = vld [vmem:[%s346_s3 + $0x18] sm:$0xff]  }
   0x2   :  { %222 = vmatpush3.bf16.msra.mxu0 %v246_v0  ;;  %225 = vmatprep.mubr.msk.bf16.mxu0 %vm276_vm0, %v275_v1  ;;  %v248_v4 = vld [vmem:[%s343_s0] sm:$0xff]  }
   0x3   :  { %223 = vmatprep.subr.bf16.mxu0 %v275_v1  ;;  %237 = vmatprep.mubr.msk.bf16.mxu1 %vm276_vm0, %v275_v1 }
   0x4   :  { %230 = vmatpush3.bf16.msra.mxu1 %v249_v3 }
   0x5   :  { %231 = vmatprep.subr.bf16.mxu1 %v275_v1 }
   0x6   :  { %224 = vmatpush3.bf16.msra.mxu0 %v247_v2 }
   0x7   :  { %10 = vsyncpa [#allocation3], 0  ;;  %v250_v5 = vld [vmem:[%s346_s3 + $0x10] sm:$0xff]   ;;  %v251_v6 = vld [vmem:[%s346_s3 + $0x8] sm:$0xff]   ;;  %vm139_vm2 = vcmask 523264  }
   0x8   :  { %232 = vmatpush3.bf16.msra.mxu1 %v250_v5  ;;  %v252_v7 = vld [vmem:[%s346_s3] sm:$0xff]   ;;  %s277_s3 = smov [#allocation2]  }
   0x9   :  { %226 = vmatmul.mubr.msk.bf16.vlgmr.msra.gmra.mxu0 %vm52_vm1, %v248_v4  ;;  %233 = vmatprep.subr.bf16.mxu1 %v275_v1  ;;  %v202_v8 = vld [vmem:[%s345_s2] ss:$0 sm:$0xff]  ;;  %s191_s9 = sshll.u32 %s277_s3, 4  ;;  %s192_s9 = int_to_ptr.vmem [resolvable:$true] %s191_s9 }
   0xa   :  { %v207_v18 = vld [vmem:[%s347_s4] ss:$0 sm:$0xff]  ;;  %s253_s2 = scalar_lea.vmem %s192_s9, 256  ;;  %p258_p1 = scmp.lt.s32.totalorder %s192_s9, %s192_s9 }
   0xb   :  { %p254_p0 = scmp.ne.s32.totalorder %s192_s9, %s253_s2  ;;  %p259_p2 = scmp.lt.s32.totalorder %s253_s2, %s253_s2 }
   0xc   :  { %234 = vmatpush3.bf16.msra.mxu1 %v251_v6 }
   0xd   :  { %235 = vmatprep.subr.bf16.mxu1 %v275_v1  ;;  %p260_p3 = por %p259_p2, %p258_p1 }
   0xf   :  { %p261_p4 = pnand %p260_p3, %p254_p0 }
  0x10   :  { %236 = vmatpush3.bf16.msra.mxu1 %v252_v7 }
  0xc9   :  { %v90_v9 = vpop.f32.mrf.mxu0 }
  0xca   :  { %v91_v11 = vadd.f32 %v202_v8, %v90_v9 }
  0xcb   :  { %v227_v10 = vpop.f32.mrf.mxu0 }
  0xcc   :  { %v97_v15 = vmax.f32 %v91_v11, 0.0 }
  0xcd   :  { %v93_v12 = vpop.f32.mrf.mxu0 }
  0xce   :  { %v94_v13 = vadd.f32 %v202_v8, %v93_v12 }
  0xcf   :  { %v228_v14 = vpop.f32.mrf.mxu0 }
  0xd0   :  { %v98_v16 = vmax.f32 %v94_v13, 0.0 }
  0xd2   :  { %v99_v17 = vpack.c.bf16 %v98_v16, %v97_v15 }
  0xd4   :  { %238 = vmatmul.mubr.msk.bf16.vlgmr.msra.gmra.mxu1 %vm139_vm2, %v99_v17 }
 0x194   :  { %v177_v19 = vpop.f32.mrf.mxu1 }
 0x195   :  { %v178_v20 = vadd.f32 %v207_v18, %v177_v19 }
 0x196   :  { %v239_v21 = vpop.f32.mrf.mxu1 }
 0x197   :  { %184 = vst.msk [vmem:[#allocation2] sm:$0xff] %vm52_vm1, %v178_v20 }
 0x198   :  { %v180_v22 = vpop.f32.mrf.mxu1 }
 0x199   :  { %v181_v23 = vadd.f32 %v207_v18, %v180_v22 }
 0x19a   :  { %v240_v24 = vpop.f32.mrf.mxu1 }
 0x19b   :  { %185 = vst.msk [vmem:[#allocation2 + $0x8] sm:$0xff] %vm52_vm1, %v181_v23 }
 0x19c   :  { %264 = shalt.err (!%p261_p4)
}
 0x19d   :  { %s278_s4 = smov 128   ;;  %s279_s10 = smov 8  }
 0x19e   :  { %197 = dma.vmem_to_hbm [thread:$0]  %s192_s9, 256, %s348_s5, [#allocation3], %s278_s4, %s278_s4, %s279_s10  }
 0x19f   :  { %273 = dma.done.wait [#allocation3], 256  }
 0x1a0   :  { %274 = vsyncadd [#allocation3], 4294967040 }
 0x1a1   :  { %201 = vsyncpa [#allocation3], 1 }

</bundles_post_ra>
